<compile_context>
chip_gen: v6e
topology: v6e:2x2x1
jax: 0.10.0
libtpu: 0.0.40
codegen_flags: <defaults>
</compile_context>

<pallas_src>
from functools import partial

import jax
import jax.numpy as jnp
from jax.experimental import pallas as pl
from jax.experimental.pallas import tpu as pltpu


def _conv2d_kernel(x_ref, w_ref, b_ref, o_ref, col_ref, *, K, W, Cin, use_bf16):
    """Fused-batch im2col conv kernel (single invocation, no grid).

    x_ref:   (N, Cin, H*W)   flattened NCHW input planes (VMEM)
    w_ref:   (Cout, D)       weight rows ordered (kh, kw, cin), depth padded to D
    b_ref:   (Cout, 1)       bias
    o_ref:   (Cout, N*H*W)   lane-dense output slab (wrapper transposes + crops)
    col_ref: (D, N*H*W)      im2col scratch (VMEM)
    """
    N = x_ref.shape[0]
    D, L = col_ref.shape
    T = K * K

    # Combined plane: image n occupies lanes [n*H*W, (n+1)*H*W) (256-aligned).
    xcat = jnp.concatenate([x_ref[n] for n in range(N)], axis=-1)   # (Cin, L)

    # im2col: tap t = (kh, kw) is the plane rotated left by s = kh*W + kw.
    # The rotation runs on the XLU slot; stores are full lane width.  Wrapped
    # columns only reach output pixels outside the (Hout, Wout) crop
    # (stride=1, padding=0 VALID), so no masking is required.
    col_ref[pl.ds(0, Cin), :] = xcat                        # tap (0, 0), s = 0
    for t in range(1, T):
        kh, kw = divmod(t, K)
        s = kh * W + kw
        col_ref[pl.ds(t * Cin, Cin), :] = pltpu.roll(xcat, shift=L - s, axis=1)

    # Zero only the depth-padding rows: their weight columns are zero, but
    # uninitialized VMEM could contain NaN/Inf (0 * NaN = NaN).
    if D > T * Cin:
        col_ref[pl.ds(T * Cin, D - T * Cin), :] = jnp.zeros(
            (D - T * Cin, L), dtype=col_ref.dtype)

    w = w_ref[...]          # (Cout, D) -- loaded once
    col = col_ref[...]      # (D, L)
    if use_bf16:            # opt-in MXU-native operands (looser numerics)
        w = w.astype(jnp.bfloat16)
        col = col.astype(jnp.bfloat16)

    # One MXU contraction for the whole batch, f32 accumulation.
    acc = jax.lax.dot_general(
        w, col, dimension_numbers=(((1,), (0,)), ((), ())),
        preferred_element_type=jnp.float32)
    o_ref[...] = (acc + b_ref[...]).astype(o_ref.dtype)     # one bias add + store


def pack_conv2d_params(weight_oihw, bias):
    """One-time parameter packing, hoisted out of the per-call jit path.

    Returns weight as (Cout, D) with rows ordered (kh, kw, cin), contiguously
    packed and depth-padded to a multiple of 8 sublanes, plus bias as (Cout, 1).
    """
    Cout, Cin, K, _ = weight_oihw.shape
    T = K * K
    D = ((T * Cin + 7) // 8) * 8
    w2 = jnp.transpose(weight_oihw, (0, 2, 3, 1)).reshape(Cout, T * Cin)
    w2 = jnp.pad(w2, ((0, 0), (0, D - T * Cin)))
    b2 = bias.reshape(Cout, 1)
    return w2, b2


@partial(jax.jit, static_argnames=("K", "use_bf16"))
def conv2d_pallas(x_nchw, w_packed, b_packed, *, K, use_bf16=False):
    """Forward matching torch.nn.Conv2d(stride=1, padding=0, bias=True)."""
    N, Cin, H, W = x_nchw.shape
    Cout, D = w_packed.shape
    Hout, Wout = H - K + 1, W - K + 1
    HW = H * W
    L = N * HW

    # Activations: contiguous reshape only -- no transpose, no extra HBM pass.
    x_flat = x_nchw.reshape(N, Cin, HW)

    kernel = partial(_conv2d_kernel, K=K, W=W, Cin=Cin, use_bf16=use_bf16)
    out = pl.pallas_call(
        kernel,
        out_shape=jax.ShapeDtypeStruct((Cout, L), x_nchw.dtype),
        in_specs=[
            pl.BlockSpec(memory_space=pltpu.MemorySpace.VMEM),   # x (whole array)
            pl.BlockSpec(memory_space=pltpu.MemorySpace.VMEM),   # packed weight
            pl.BlockSpec(memory_space=pltpu.MemorySpace.VMEM),   # bias
        ],
        out_specs=pl.BlockSpec(memory_space=pltpu.MemorySpace.VMEM),
        scratch_shapes=[pltpu.VMEM((D, L), jnp.float32)],
    )(x_flat, w_packed, b_packed)

    # Tiny (16 KiB) output slab: reshape -> NCHW transpose -> crop VALID window.
    out = out.reshape(Cout, N, H, W).transpose(1, 0, 2, 3)
    return out[:, :, :Hout, :Wout]


if __name__ == "__main__":
    # SimpleConv2d(in_channels=4, out_channels=8, kernel_size=3)
    N, Cin, H, W = 2, 4, 16, 16
    Cout, K = 8, 3

    key = jax.random.PRNGKey(0)
    kx, kw, kb = jax.random.split(key, 3)
    x = jax.random.normal(kx, (N, Cin, H, W), jnp.float32)
    # Deterministic parameter init (shapes match nn.Conv2d; values synthetic).
    fan_in = Cin * K * K
    weight = jax.random.uniform(kw, (Cout, Cin, K, K), jnp.float32,
                                minval=-1.0, maxval=1.0) / jnp.sqrt(fan_in)
    bias = jax.random.uniform(kb, (Cout,), jnp.float32,
                              minval=-1.0, maxval=1.0) / jnp.sqrt(fan_in)

    # Parameter packing happens once, outside the per-call jit path.
    w_packed, b_packed = pack_conv2d_params(weight, bias)

    out = jax.block_until_ready(conv2d_pallas(x, w_packed, b_packed, K=K))

    # Reference check (same semantics as torch Conv2d, stride=1, padding=0).
    ref = jax.lax.conv_general_dilated(
        x, weight, window_strides=(1, 1), padding="VALID",
        dimension_numbers=("NCHW", "OIHW", "NCHW"))
    ref = ref + bias[None, :, None, None]

    assert out.shape == (N, Cout, H - K + 1, W - K + 1), out.shape
    max_err = float(jnp.max(jnp.abs(out - ref)))
    assert jnp.allclose(out, ref, atol=1e-4, rtol=1e-4), (
        "mismatch vs reference, max abs err = %f" % max_err)

    print("KERNEL_OK")
</pallas_src>

<mosaic_0001>
module attributes {stable_mosaic.version = 11 : i64} {
  func.func @_conv2d_kernel(%arg0: memref<2x4x256xf32, #tpu.memory_space<vmem>>, %arg1: memref<8x40xf32, #tpu.memory_space<vmem>>, %arg2: memref<8x1xf32, #tpu.memory_space<vmem>>, %arg3: memref<8x512xf32, #tpu.memory_space<vmem>>, %arg4: memref<40x512xf32, #tpu.memory_space<vmem>>) attributes {dimension_semantics = [], scalar_prefetch = 0 : i64, scratch_operands = 1 : i64, tpu.core_type = #tpu.core_type<tc>} {
    %c0 = arith.constant 0 : index
    %c0_0 = arith.constant 0 : index
    %c0_1 = arith.constant 0 : index
    %0 = vector.load %arg0[%c0, %c0_0, %c0_1] : memref<2x4x256xf32, #tpu.memory_space<vmem>>, vector<1x4x256xf32>
    %1 = vector.shape_cast %0 : vector<1x4x256xf32> to vector<4x256xf32>
    %c1 = arith.constant 1 : index
    %c0_2 = arith.constant 0 : index
    %c0_3 = arith.constant 0 : index
    %2 = vector.load %arg0[%c1, %c0_2, %c0_3] : memref<2x4x256xf32, #tpu.memory_space<vmem>>, vector<1x4x256xf32>
    %3 = vector.shape_cast %2 : vector<1x4x256xf32> to vector<4x256xf32>
    %4 = tpu.concatenate %1, %3 in 1 : vector<4x256xf32>, vector<4x256xf32> -> vector<4x512xf32>
    %c0_4 = arith.constant 0 : index
    %c0_5 = arith.constant 0 : index
    %5 = vector.load %arg4[%c0_4, %c0_5] : memref<40x512xf32, #tpu.memory_space<vmem>>, vector<4x512xf32>
    tpu.vector_store %arg4[%c0_4, %c0_5], %4 {strides = array<i32>} : memref<40x512xf32, #tpu.memory_space<vmem>>, vector<4x512xf32>,
    %c511_i32 = arith.constant 511 : i32
    %6 = tpu.dynamic_rotate %4 by %c511_i32 dim 1 : vector<4x512xf32>, i32 -> vector<4x512xf32>
    %c4 = arith.constant 4 : index
    %c0_6 = arith.constant 0 : index
    %7 = vector.load %arg4[%c4, %c0_6] : memref<40x512xf32, #tpu.memory_space<vmem>>, vector<4x512xf32>
    tpu.vector_store %arg4[%c4, %c0_6], %6 {strides = array<i32>} : memref<40x512xf32, #tpu.memory_space<vmem>>, vector<4x512xf32>,
    %c510_i32 = arith.constant 510 : i32
    %8 = tpu.dynamic_rotate %4 by %c510_i32 dim 1 : vector<4x512xf32>, i32 -> vector<4x512xf32>
    %c8 = arith.constant 8 : index
    %c0_7 = arith.constant 0 : index
    %9 = vector.load %arg4[%c8, %c0_7] : memref<40x512xf32, #tpu.memory_space<vmem>>, vector<4x512xf32>
    tpu.vector_store %arg4[%c8, %c0_7], %8 {strides = array<i32>} : memref<40x512xf32, #tpu.memory_space<vmem>>, vector<4x512xf32>,
    %c496_i32 = arith.constant 496 : i32
    %10 = tpu.dynamic_rotate %4 by %c496_i32 dim 1 : vector<4x512xf32>, i32 -> vector<4x512xf32>
    %c12 = arith.constant 12 : index
    %c0_8 = arith.constant 0 : index
    %11 = vector.load %arg4[%c12, %c0_8] : memref<40x512xf32, #tpu.memory_space<vmem>>, vector<4x512xf32>
    tpu.vector_store %arg4[%c12, %c0_8], %10 {strides = array<i32>} : memref<40x512xf32, #tpu.memory_space<vmem>>, vector<4x512xf32>,
    %c495_i32 = arith.constant 495 : i32
    %12 = tpu.dynamic_rotate %4 by %c495_i32 dim 1 : vector<4x512xf32>, i32 -> vector<4x512xf32>
    %c16 = arith.constant 16 : index
    %c0_9 = arith.constant 0 : index
    %13 = vector.load %arg4[%c16, %c0_9] : memref<40x512xf32, #tpu.memory_space<vmem>>, vector<4x512xf32>
    tpu.vector_store %arg4[%c16, %c0_9], %12 {strides = array<i32>} : memref<40x512xf32, #tpu.memory_space<vmem>>, vector<4x512xf32>,
    %c494_i32 = arith.constant 494 : i32
    %14 = tpu.dynamic_rotate %4 by %c494_i32 dim 1 : vector<4x512xf32>, i32 -> vector<4x512xf32>
    %c20 = arith.constant 20 : index
    %c0_10 = arith.constant 0 : index
    %15 = vector.load %arg4[%c20, %c0_10] : memref<40x512xf32, #tpu.memory_space<vmem>>, vector<4x512xf32>
    tpu.vector_store %arg4[%c20, %c0_10], %14 {strides = array<i32>} : memref<40x512xf32, #tpu.memory_space<vmem>>, vector<4x512xf32>,
    %c480_i32 = arith.constant 480 : i32
    %16 = tpu.dynamic_rotate %4 by %c480_i32 dim 1 : vector<4x512xf32>, i32 -> vector<4x512xf32>
    %c24 = arith.constant 24 : index
    %c0_11 = arith.constant 0 : index
    %17 = vector.load %arg4[%c24, %c0_11] : memref<40x512xf32, #tpu.memory_space<vmem>>, vector<4x512xf32>
    tpu.vector_store %arg4[%c24, %c0_11], %16 {strides = array<i32>} : memref<40x512xf32, #tpu.memory_space<vmem>>, vector<4x512xf32>,
    %c479_i32 = arith.constant 479 : i32
    %18 = tpu.dynamic_rotate %4 by %c479_i32 dim 1 : vector<4x512xf32>, i32 -> vector<4x512xf32>
    %c28 = arith.constant 28 : index
    %c0_12 = arith.constant 0 : index
    %19 = vector.load %arg4[%c28, %c0_12] : memref<40x512xf32, #tpu.memory_space<vmem>>, vector<4x512xf32>
    tpu.vector_store %arg4[%c28, %c0_12], %18 {strides = array<i32>} : memref<40x512xf32, #tpu.memory_space<vmem>>, vector<4x512xf32>,
    %c478_i32 = arith.constant 478 : i32
    %20 = tpu.dynamic_rotate %4 by %c478_i32 dim 1 : vector<4x512xf32>, i32 -> vector<4x512xf32>
    %c32 = arith.constant 32 : index
    %c0_13 = arith.constant 0 : index
    %21 = vector.load %arg4[%c32, %c0_13] : memref<40x512xf32, #tpu.memory_space<vmem>>, vector<4x512xf32>
    tpu.vector_store %arg4[%c32, %c0_13], %20 {strides = array<i32>} : memref<40x512xf32, #tpu.memory_space<vmem>>, vector<4x512xf32>,
    %cst = arith.constant 0.000000e+00 : f32
    %22 = vector.broadcast %cst : f32 to vector<4x512xf32>
    %c36 = arith.constant 36 : index
    %c0_14 = arith.constant 0 : index
    %23 = vector.load %arg4[%c36, %c0_14] : memref<40x512xf32, #tpu.memory_space<vmem>>, vector<4x512xf32>
    tpu.vector_store %arg4[%c36, %c0_14], %22 {strides = array<i32>} : memref<40x512xf32, #tpu.memory_space<vmem>>, vector<4x512xf32>,
    %c0_15 = arith.constant 0 : index
    %c0_16 = arith.constant 0 : index
    %24 = vector.load %arg1[%c0_15, %c0_16] : memref<8x40xf32, #tpu.memory_space<vmem>>, vector<8x40xf32>
    %c0_17 = arith.constant 0 : index
    %c0_18 = arith.constant 0 : index
    %25 = vector.load %arg4[%c0_17, %c0_18] : memref<40x512xf32, #tpu.memory_space<vmem>>, vector<40x512xf32>
    %cst_19 = arith.constant dense<0.000000e+00> : vector<8x512xf32>
    %26 = tpu.matmul %24, %25, %cst_19 {dimension_numbers = #tpu.dot_dimension_numbers<[1], [0], [0], [1], [0, 0, 1, 1], [], []>} : vector<8x40xf32>, vector<40x512xf32>, vector<8x512xf32> -> vector<8x512xf32>
    %c0_20 = arith.constant 0 : index
    %c0_21 = arith.constant 0 : index
    %27 = vector.load %arg2[%c0_20, %c0_21] : memref<8x1xf32, #tpu.memory_space<vmem>>, vector<8x1xf32>
    %28 = vector.broadcast %27 : vector<8x1xf32> to vector<8x512xf32>
    %29 = arith.addf %26, %28 : vector<8x512xf32>
    %c0_22 = arith.constant 0 : index
    %c0_23 = arith.constant 0 : index
    %30 = vector.load %arg3[%c0_22, %c0_23] : memref<8x512xf32, #tpu.memory_space<vmem>>, vector<8x512xf32>
    tpu.vector_store %arg3[%c0_22, %c0_23], %29 {strides = array<i32>} : memref<8x512xf32, #tpu.memory_space<vmem>>, vector<8x512xf32>,
    return
  }
}

</mosaic_0001>

<bundles_post_ra>
// kernel: conv2d_pallas.1
= control target key start
LH: loop header
LB: loop body
LE: loop exit
PB: predicated region body
PF: predicated region fallthrough
CT: control target
= control target key end

     0   :  { %v414_v2 = vmov 0.0   ;;  %s415_s16 = smov 95   ;;  %s416_s17 = smov 94   ;;  %v423_v5 = vmov 0   ;;  %v35_v7 = vlaneseq  ;;  %vm244_vm8 = vcmask 326656   ;;  %s486_s0 = inlined_call_operand.vmem [shape: f32[2,4,256], index: 0, kind: input, shape index: {}]   ;;  %s487_s2 = inlined_call_operand.vmem [shape: f32[8,1], index: 2, kind: input, shape index: {}]   ;;  %s488_s1 = inlined_call_operand.vmem [shape: f32[8,40], index: 1, kind: input, shape index: {}]   ;;  %s489_s3 = inlined_call_operand.vmem [shape: f32[8,512], index: 3, kind: output, shape index: {}]  }
   0x1   :  { %v398_v0 = vld [vmem:[%s486_s0 + $0x8] sm:$0xff]  ;;  %v14_v1 = vld [vmem:[%s486_s0] sm:$0xff]  ;;  %214 = vst [vmem:[#allocation2 + $0x48] sm:$0xf0] %v414_v2  ;;  %213 = vst [vmem:[#allocation2 + $0x20] sm:$0xf0] %v414_v2  ;;  %312 = vmatprep.mubr.f32.mxu0 %v414_v2  ;;  %383 = vmatprep.mubr.f32.mxu1 %v414_v2 }
   0x2   :  { %215 = vst [vmem:[#allocation2 + $0x70] sm:$0xf0] %v414_v2  ;;  %216 = vst [vmem:[#allocation2 + $0x90] sm:$0xf0] %v414_v2  ;;  %171 = vrot.lane.b32.xlu1 %v398_v0, %s415_s16  ;;  %167 = vrot.lane.b32.xlu0 %v14_v1, %s415_s16  ;;  %v21_v3 = vcombine.high %v398_v0, %v398_v0  ;;  %v18_v4 = vcombine.high %v14_v1, %v14_v1  ;;  %s417_s0 = smov 110   ;;  %s418_s18 = smov 96  }
   0x3   :  { %25 = vst [vmem:[#allocation2 + $0x50] sm:$0xf] %v398_v0  ;;  %23 = vst [vmem:[#allocation2] sm:$0xf] %v14_v1  ;;  %s419_s19 = smov 112   ;;  %s420_s20 = smov 111   ;;  %411 = vset.pattern.permute.xlu0 %v423_v5 }
   0x4   :  { %26 = vst [vmem:[#allocation2 + $0x18] sm:$0xf] %v21_v3  ;;  %24 = vst [vmem:[#allocation2 + $0x38] sm:$0xf] %v18_v4  ;;  %s421_s21 = smov 127   ;;  %s422_s22 = smov 126  }
   0x5   :  { %v238_v6 = vld [vmem:[%s487_s2] sm:$0xff]  ;;  %v453_v8 = vand.u32 127, %v35_v7 }
   0x6   :  { %173 = vrot.lane.b32.xlu1 %v21_v3, %s415_s16  ;;  %169 = vrot.lane.b32.xlu0 %v18_v4, %s415_s16 }
   0x7   :  { %vm175_vm0 = vcmp.lt.s32.totalorder %v453_v8, 95  ;;  %vm204_vm1 = vcmp.lt.s32.totalorder %v453_v8, 94  ;;  %vm129_vm2 = vcmp.lt.s32.totalorder %v453_v8, 110  ;;  %vm158_vm3 = vcmp.lt.s32.totalorder %v453_v8, 96 }
   0x8   :  { %vm83_vm4 = vcmp.lt.s32.totalorder %v453_v8, 112  ;;  %vm112_vm5 = vcmp.lt.s32.totalorder %v453_v8, 111  ;;  %vm37_vm6 = vcmp.lt.s32.totalorder %v453_v8, 127  ;;  %vm66_vm7 = vcmp.lt.s32.totalorder %v453_v8, 126 }
   0xa   :  { %198 = vrot.lane.b32.xlu1 %v18_v4, %s416_s17  ;;  %196 = vrot.lane.b32.xlu0 %v14_v1, %s416_s17 }
   0xe   :  { %202 = vrot.lane.b32.xlu1 %v21_v3, %s416_s17  ;;  %200 = vrot.lane.b32.xlu0 %v398_v0, %s416_s17 }
  0x12   :  { %123 = vrot.lane.b32.xlu1 %v18_v4, %s417_s0  ;;  %121 = vrot.lane.b32.xlu0 %v14_v1, %s417_s0 }
  0x16   :  { %127 = vrot.lane.b32.xlu1 %v21_v3, %s417_s0  ;;  %125 = vrot.lane.b32.xlu0 %v398_v0, %s417_s0 }
  0x1a   :  { %152 = vrot.lane.b32.xlu1 %v18_v4, %s418_s18  ;;  %150 = vrot.lane.b32.xlu0 %v14_v1, %s418_s18 }
  0x1e   :  { %156 = vrot.lane.b32.xlu1 %v21_v3, %s418_s18  ;;  %154 = vrot.lane.b32.xlu0 %v398_v0, %s418_s18 }
  0x22   :  { %77 = vrot.lane.b32.xlu1 %v18_v4, %s419_s19  ;;  %75 = vrot.lane.b32.xlu0 %v14_v1, %s419_s19 }
  0x26   :  { %81 = vrot.lane.b32.xlu1 %v21_v3, %s419_s19  ;;  %79 = vrot.lane.b32.xlu0 %v398_v0, %s419_s19 }
  0x2a   :  { %106 = vrot.lane.b32.xlu1 %v18_v4, %s420_s20  ;;  %104 = vrot.lane.b32.xlu0 %v14_v1, %s420_s20 }
  0x2e   :  { %110 = vrot.lane.b32.xlu1 %v21_v3, %s420_s20  ;;  %108 = vrot.lane.b32.xlu0 %v398_v0, %s420_s20 }
  0x32   :  { %29 = vrot.lane.b32.xlu1 %v18_v4, %s421_s21  ;;  %27 = vrot.lane.b32.xlu0 %v14_v1, %s421_s21 }
  0x36   :  { %33 = vrot.lane.b32.xlu1 %v21_v3, %s421_s21  ;;  %31 = vrot.lane.b32.xlu0 %v398_v0, %s421_s21 }
  0x3a   :  { %60 = vrot.lane.b32.xlu1 %v18_v4, %s422_s22  ;;  %58 = vrot.lane.b32.xlu0 %v14_v1, %s422_s22 }
  0x3e   :  { %64 = vrot.lane.b32.xlu1 %v21_v3, %s422_s22  ;;  %62 = vrot.lane.b32.xlu0 %v398_v0, %s422_s22 }
  0x42   :  { %241 = vperm.xlu0 %411, %v238_v6  }
  0x74   :  { %v172_v9 = vpop.permute.xlu1 %171  ;;  %v168_v10 = vpop.permute.xlu0 %167 }
  0x78   :  { %v174_v11 = vpop.permute.xlu1 %173  ;;  %v170_v12 = vpop.permute.xlu0 %169 }
  0x79   :  { %v176_v13 = vsel %vm175_vm0, %v172_v9, %v174_v11  ;;  %v179_v14 = vsel %vm175_vm0, %v174_v11, %v168_v10  ;;  %v177_v15 = vsel %vm175_vm0, %v170_v12, %v172_v9  ;;  %v178_v16 = vsel %vm175_vm0, %v168_v10, %v170_v12 }
  0x7a   :  { %v186_v17 = vrot.slane %v176_v13, 4  ;;  %v187_v18 = vrot.slane %v179_v14, 4  ;;  %v184_v19 = vrot.slane %v178_v16, 4  ;;  %v185_v20 = vrot.slane %v177_v15, 4 }
  0x7c   :  { %194 = vst [vmem:[#allocation2 + $0x98] sm:$0xf0] %v186_v17  ;;  %195 = vst [vmem:[#allocation2 + $0x60] sm:$0xf0] %v187_v18  ;;  %v199_v21 = vpop.permute.xlu1 %198  ;;  %v197_v22 = vpop.permute.xlu0 %196 }
  0x7d   :  { %192 = vst [vmem:[#allocation2 + $0x58] sm:$0xf0] %v184_v19  ;;  %193 = vst [vmem:[#allocation2 + $0x10] sm:$0xf0] %v185_v20  ;;  %v207_v23 = vsel %vm204_vm1, %v197_v22, %v199_v21 }
  0x7e   :  { %209 = vst [vmem:[#allocation2 + $0x20] sm:$0xf] %v207_v23 }
  0x80   :  { %v203_v24 = vpop.permute.xlu1 %202  ;;  %v201_v25 = vpop.permute.xlu0 %200 }
  0x81   :  { %v208_v26 = vsel %vm204_vm1, %v203_v24, %v197_v22  ;;  %v205_v27 = vsel %vm204_vm1, %v201_v25, %v203_v24  ;;  %v206_v28 = vsel %vm204_vm1, %v199_v21, %v201_v25 }
  0x82   :  { %212 = vst [vmem:[#allocation2 + $0x90] sm:$0xf] %v208_v26  ;;  %210 = vst [vmem:[#allocation2 + $0x48] sm:$0xf] %v206_v28 }
  0x83   :  { %211 = vst [vmem:[#allocation2 + $0x70] sm:$0xf] %v205_v27 }
  0x84   :  { %v124_v29 = vpop.permute.xlu1 %123  ;;  %v122_v30 = vpop.permute.xlu0 %121 }
  0x85   :  { %v132_v31 = vsel %vm129_vm2, %v122_v30, %v124_v29  ;;  %v234_v44 = vld [vmem:[#allocation2 + $0x20] sm:$0xff] }
  0x86   :  { %v138_v32 = vrot.slane %v132_v31, 4 }
  0x88   :  { %146 = vst [vmem:[#allocation2 + $0x8] sm:$0xf0] %v138_v32  ;;  %v128_v33 = vpop.permute.xlu1 %127  ;;  %v126_v34 = vpop.permute.xlu0 %125 }
  0x89   :  { %v133_v35 = vsel %vm129_vm2, %v128_v33, %v122_v30  ;;  %v130_v36 = vsel %vm129_vm2, %v126_v34, %v128_v33  ;;  %v131_v37 = vsel %vm129_vm2, %v124_v29, %v126_v34  ;;  %v235_v38 = vld [vmem:[#allocation2 + $0x48] sm:$0xff]  ;;  %v237_v39 = vld [vmem:[#allocation2 + $0x90] sm:$0xff] }
  0x8a   :  { %v236_v40 = vld [vmem:[#allocation2 + $0x70] sm:$0xff]  ;;  %v141_v41 = vrot.slane %v133_v35, 4  ;;  %v139_v42 = vrot.slane %v131_v37, 4  ;;  %v140_v43 = vrot.slane %v130_v36, 4  ;;  %270 = vmatprep.subr.mxu0 %v235_v38  ;;  %341 = vmatprep.subr.mxu1 %v237_v39 }
  0x8b   :  { %271 = vmatpush1.msra.mxu0 %v234_v44  ;;  %342 = vmatpush1.msra.mxu1 %v236_v40 }
  0x8c   :  { %149 = vst [vmem:[#allocation2 + $0x40] sm:$0xf0] %v141_v41  ;;  %147 = vst [vmem:[#allocation2 + $0x88] sm:$0xf0] %v139_v42  ;;  %v153_v45 = vpop.permute.xlu1 %152  ;;  %v151_v46 = vpop.permute.xlu0 %150 }
  0x8d   :  { %148 = vst [vmem:[#allocation2 + $0x28] sm:$0xf0] %v140_v43  ;;  %v161_v47 = vsel %vm158_vm3, %v151_v46, %v153_v45  ;;  %v217_v43 = vld [vmem:[%s488_s1] sm:$0xff] }
  0x8e   :  { %163 = vst [vmem:[#allocation2 + $0x58] sm:$0xf] %v161_v47 }
  0x90   :  { %v157_v48 = vpop.permute.xlu1 %156  ;;  %v155_v49 = vpop.permute.xlu0 %154 }
  0x91   :  { %v162_v50 = vsel %vm158_vm3, %v157_v48, %v151_v46  ;;  %v159_v51 = vsel %vm158_vm3, %v155_v49, %v157_v48  ;;  %v160_v52 = vsel %vm158_vm3, %v153_v45, %v155_v49 }
  0x92   :  { %166 = vst [vmem:[#allocation2 + $0x60] sm:$0xf] %v162_v50  ;;  %164 = vst [vmem:[#allocation2 + $0x10] sm:$0xf] %v160_v52 }
  0x93   :  { %165 = vst [vmem:[#allocation2 + $0x98] sm:$0xf] %v159_v51 }
  0x94   :  { %v78_v53 = vpop.permute.xlu1 %77  ;;  %v76_v54 = vpop.permute.xlu0 %75 }
  0x95   :  { %v86_v55 = vsel %vm83_vm4, %v76_v54, %v78_v53  ;;  %v230_v4 = vld [vmem:[#allocation2 + $0x58] sm:$0xff] }
  0x96   :  { %v92_v56 = vrot.slane %v86_v55, 4 }
  0x98   :  { %100 = vst [vmem:[#allocation2 + $0x30] sm:$0xf0] %v92_v56  ;;  %v82_v57 = vpop.permute.xlu1 %81  ;;  %v80_v58 = vpop.permute.xlu0 %79 }
  0x99   :  { %v87_v59 = vsel %vm83_vm4, %v82_v57, %v76_v54  ;;  %v84_v60 = vsel %vm83_vm4, %v80_v58, %v82_v57  ;;  %v85_v61 = vsel %vm83_vm4, %v78_v53, %v80_v58  ;;  %v231_v62 = vld [vmem:[#allocation2 + $0x10] sm:$0xff]  ;;  %v233_v63 = vld [vmem:[#allocation2 + $0x60] sm:$0xff] }
  0x9a   :  { %v232_v0 = vld [vmem:[#allocation2 + $0x98] sm:$0xff]  ;;  %v95_v1 = vrot.slane %v87_v59, 4  ;;  %v93_v2 = vrot.slane %v85_v61, 4  ;;  %v94_v3 = vrot.slane %v84_v60, 4  ;;  %272 = vmatprep.subr.mxu0 %v231_v62  ;;  %343 = vmatprep.subr.mxu1 %v233_v63 }
  0x9b   :  { %273 = vmatpush1.msra.mxu0 %v230_v4  ;;  %344 = vmatpush1.msra.mxu1 %v232_v0 }
  0x9c   :  { %103 = vst [vmem:[#allocation2 + $0x80] sm:$0xf0] %v95_v1  ;;  %101 = vst [vmem:[#allocation2 + $0x68] sm:$0xf0] %v93_v2  ;;  %v107_v5 = vpop.permute.xlu1 %106  ;;  %v105_v6 = vpop.permute.xlu0 %104 }
  0x9d   :  { %102 = vst [vmem:[#allocation2 + $0x78] sm:$0xf0] %v94_v3  ;;  %v115_v7 = vsel %vm112_vm5, %v105_v6, %v107_v5 }
  0x9e   :  { %117 = vst [vmem:[#allocation2 + $0x8] sm:$0xf] %v115_v7 }
  0xa0   :  { %v111_v9 = vpop.permute.xlu1 %110  ;;  %v109_v10 = vpop.permute.xlu0 %108 }
  0xa1   :  { %v116_v11 = vsel %vm112_vm5, %v111_v9, %v105_v6  ;;  %v113_v12 = vsel %vm112_vm5, %v109_v10, %v111_v9  ;;  %v114_v13 = vsel %vm112_vm5, %v107_v5, %v109_v10 }
  0xa2   :  { %120 = vst [vmem:[#allocation2 + $0x40] sm:$0xf] %v116_v11  ;;  %118 = vst [vmem:[#allocation2 + $0x88] sm:$0xf] %v114_v13 }
  0xa3   :  { %119 = vst [vmem:[#allocation2 + $0x28] sm:$0xf] %v113_v12 }
  0xa4   :  { %v30_v14 = vpop.permute.xlu1 %29  ;;  %v28_v15 = vpop.permute.xlu0 %27 }
  0xa5   :  { %v40_v16 = vsel %vm37_vm6, %v28_v15, %v30_v14  ;;  %v226_v29 = vld [vmem:[#allocation2 + $0x8] sm:$0xff] }
  0xa6   :  { %v46_v17 = vrot.slane %v40_v16, 4 }
  0xa8   :  { %54 = vst [vmem:[#allocation2] sm:$0xf0] %v46_v17  ;;  %v34_v18 = vpop.permute.xlu1 %33  ;;  %v32_v19 = vpop.permute.xlu0 %31 }
  0xa9   :  { %v41_v20 = vsel %vm37_vm6, %v34_v18, %v28_v15  ;;  %v38_v21 = vsel %vm37_vm6, %v32_v19, %v34_v18  ;;  %v39_v22 = vsel %vm37_vm6, %v30_v14, %v32_v19  ;;  %v227_v23 = vld [vmem:[#allocation2 + $0x88] sm:$0xff]  ;;  %v229_v24 = vld [vmem:[#allocation2 + $0x40] sm:$0xff] }
  0xaa   :  { %v228_v25 = vld [vmem:[#allocation2 + $0x28] sm:$0xff]  ;;  %v49_v26 = vrot.slane %v41_v20, 4  ;;  %v47_v27 = vrot.slane %v39_v22, 4  ;;  %v48_v28 = vrot.slane %v38_v21, 4  ;;  %274 = vmatprep.subr.mxu0 %v227_v23  ;;  %345 = vmatprep.subr.mxu1 %v229_v24 }
  0xab   :  { %275 = vmatpush1.msra.mxu0 %v226_v29  ;;  %346 = vmatpush1.msra.mxu1 %v228_v25 }
  0xac   :  { %57 = vst [vmem:[#allocation2 + $0x18] sm:$0xf0] %v49_v26  ;;  %55 = vst [vmem:[#allocation2 + $0x38] sm:$0xf0] %v47_v27  ;;  %v61_v30 = vpop.permute.xlu1 %60  ;;  %v59_v31 = vpop.permute.xlu0 %58 }
  0xad   :  { %56 = vst [vmem:[#allocation2 + $0x50] sm:$0xf0] %v48_v28  ;;  %v69_v32 = vsel %vm66_vm7, %v59_v31, %v61_v30 }
  0xae   :  { %71 = vst [vmem:[#allocation2 + $0x30] sm:$0xf] %v69_v32 }
  0xaf   :  { %v218_v44 = vld [vmem:[#allocation2] sm:$0xff] }
  0xb0   :  { %v65_v33 = vpop.permute.xlu1 %64  ;;  %v63_v34 = vpop.permute.xlu0 %62 }
  0xb1   :  { %v70_v35 = vsel %vm66_vm7, %v65_v33, %v59_v31  ;;  %v67_v36 = vsel %vm66_vm7, %v63_v34, %v65_v33  ;;  %v68_v37 = vsel %vm66_vm7, %v61_v30, %v63_v34 }
  0xb2   :  { %74 = vst [vmem:[#allocation2 + $0x80] sm:$0xf] %v70_v35  ;;  %72 = vst [vmem:[#allocation2 + $0x68] sm:$0xf] %v68_v37 }
  0xb3   :  { %73 = vst [vmem:[#allocation2 + $0x78] sm:$0xf] %v67_v36  ;;  %v219_v41 = vld [vmem:[#allocation2 + $0x38] sm:$0xff] }
  0xb4   :  { %v221_v42 = vld [vmem:[#allocation2 + $0x18] sm:$0xff]  ;;  %v220_v45 = vld [vmem:[#allocation2 + $0x50] sm:$0xff] }
  0xb5   :  { %v222_v40 = vld [vmem:[#allocation2 + $0x30] sm:$0xff] }
  0xb9   :  { %v223_v38 = vld [vmem:[#allocation2 + $0x68] sm:$0xff]  ;;  %v225_v39 = vld [vmem:[#allocation2 + $0x80] sm:$0xff] }
  0xba   :  { %v224_v8 = vld [vmem:[#allocation2 + $0x78] sm:$0xff]  ;;  %276 = vmatprep.subr.mxu0 %v223_v38  ;;  %347 = vmatprep.subr.mxu1 %v225_v39 }
  0xbb   :  { %277 = vmatpush1.msra.mxu0 %v222_v40  ;;  %348 = vmatpush1.msra.mxu1 %v224_v8 }
  0xbc   :  { %278 = vmatprep.subr.mxu0 %v219_v41  ;;  %349 = vmatprep.subr.mxu1 %v221_v42 }
  0xbd   :  { %279 = vmatpush1.msra.mxu0 %v218_v44  ;;  %350 = vmatpush1.msra.mxu1 %v220_v45  ;;  %v242_v46 = vpop.permute.xlu0 %241 }
  0xbe   :  { %399 = vmatmul.mubr.msk.f32.vlgmr.msra.gmra.mxu0 %vm244_vm8, %v217_v43  ;;  %400 = vmatmul.mubr.msk.f32.vlgmr.msra.gmra.mxu1 %vm244_vm8, %v217_v43 }
 0x17e   :  { %v385_v47 = vpop.f32.mrf.mxu1  ;;  %v314_v48 = vpop.f32.mrf.mxu0 }
 0x17f   :  { %v386_v49 = vadd.f32 %v385_v47, %v242_v46  ;;  %v315_v50 = vadd.f32 %v314_v48, %v242_v46 }
 0x180   :  { %v316_v51 = vpop.f32.mrf.mxu0  ;;  %v387_v52 = vpop.f32.mrf.mxu1 }
 0x181   :  { %392 = vst [vmem:[%s489_s3 + $0x10] sm:$0xff] %v386_v49  ;;  %390 = vst [vmem:[%s489_s3] sm:$0xff] %v315_v50  ;;  %v317_v53 = vadd.f32 %v316_v51, %v242_v46  ;;  %v388_v54 = vadd.f32 %v387_v52, %v242_v46 }
 0x183   :  { %391 = vst [vmem:[%s489_s3 + $0x8] sm:$0xff] %v317_v53  ;;  %393 = vst [vmem:[%s489_s3 + $0x18] sm:$0xff] %v388_v54 }

</bundles_post_ra>
